<compile_context>
chip_gen: v7x
topology: tpu7x:2x2x1
jax: 0.10.0
libtpu: 0.0.40
codegen_flags: <defaults>
</compile_context>

<pallas_src>
import functools

import jax
import jax.numpy as jnp
from jax.experimental import pallas as pl
from jax.experimental.pallas import tpu as pltpu


LANES = 128
# Largest padded row count handled as a single full-array block (no grid):
# 4096 rows * 128 lanes * 4 B = 2 MiB per input stream -> fits VMEM on
# v5e/v6e (128 MiB) and v7x (64 MiB) with huge headroom.
_SINGLE_BLOCK_MAX_ROWS = 4096
# Row tile for the streaming (large-input) path: 1024*128*4 B = 512 KiB per
# buffer -> 3 inputs x 2 pipeline buffers = 3 MiB of VMEM, safe on all chips.
_TILE_ROWS = 1024


# ----------------- single-block kernels (no grid, no scratch) ---------------

def _single_kernel_lam(x_ref, y_ref, l_ref, o_ref, *, scale):
    d = x_ref[...] - y_ref[...]
    # 0.5**lam == exp2(-lam): transcendental goes to the EUP slot.
    val = d * d * jnp.exp2(-l_ref[...])
    o_ref[...] = jnp.sum(val, keepdims=True) * scale


def _single_kernel_nolam(x_ref, y_ref, o_ref, *, scale):
    d = x_ref[...] - y_ref[...]
    o_ref[...] = jnp.sum(d * d, keepdims=True) * scale


# -------------- tiled streaming kernels (vreg-shaped accumulator) -----------

def _tiled_kernel_lam(x_ref, y_ref, l_ref, o_ref, acc_ref, *, scale):
    @pl.when(pl.program_id(0) == 0)
    def _():
        acc_ref[...] = jnp.zeros_like(acc_ref)

    d = x_ref[...] - y_ref[...]
    val = d * d * jnp.exp2(-l_ref[...])
    # (8,128) vreg-shaped partial sums: pure VPU adds in the hot loop.
    acc_ref[...] += jnp.sum(val.reshape(-1, 8, LANES), axis=0)

    @pl.when(pl.program_id(0) == pl.num_programs(0) - 1)
    def _():
        # One cross-lane/sublane reduction at finalize only.
        o_ref[...] = jnp.sum(acc_ref[...], keepdims=True) * scale


def _tiled_kernel_nolam(x_ref, y_ref, o_ref, acc_ref, *, scale):
    @pl.when(pl.program_id(0) == 0)
    def _():
        acc_ref[...] = jnp.zeros_like(acc_ref)

    d = x_ref[...] - y_ref[...]
    acc_ref[...] += jnp.sum((d * d).reshape(-1, 8, LANES), axis=0)

    @pl.when(pl.program_id(0) == pl.num_programs(0) - 1)
    def _():
        o_ref[...] = jnp.sum(acc_ref[...], keepdims=True) * scale


# --------------------------------- wrapper ----------------------------------

def _pad_to_rows(flat, padded_rows):
    pad = padded_rows * LANES - flat.shape[0]
    if pad:
        flat = jnp.concatenate([flat, jnp.zeros((pad,), flat.dtype)])
    return flat.reshape(padded_rows, LANES)


def exp_decay_loss(x, y, lam):
    """Scalar mean of (x - y)^2 * 0.5**lam, computed in a Pallas TPU kernel."""
    x = jnp.asarray(x, jnp.float32)
    y = jnp.asarray(y, jnp.float32)
    lam = jnp.asarray(lam, jnp.float32)

    total = x.size
    rows = -(-total // LANES)            # ceil(total / 128)
    rows8 = ((rows + 7) // 8) * 8        # pad rows to a multiple of 8

    scalar_lam = lam.size == 1
    inv_total = 1.0 / float(total)       # divide by TRUE element count

    if rows8 <= _SINGLE_BLOCK_MAX_ROWS:
        padded_rows = rows8
        single = True
    else:
        padded_rows = -(-rows // _TILE_ROWS) * _TILE_ROWS
        single = False

    # Zero padding is exact: padded (x - y) == 0 so padded terms contribute 0.
    streams = [
        _pad_to_rows(x.reshape(-1), padded_rows),
        _pad_to_rows(y.reshape(-1), padded_rows),
    ]
    if not scalar_lam:
        lam_full = jnp.broadcast_to(lam, x.shape).reshape(-1)
        streams.append(_pad_to_rows(lam_full, padded_rows))

    if single:
        kernel = functools.partial(
            _single_kernel_nolam if scalar_lam else _single_kernel_lam,
            scale=inv_total,
        )
        out = pl.pallas_call(
            kernel,
            out_shape=jax.ShapeDtypeStruct((1, 1), jnp.float32),
        )(*streams)
    else:
        kernel = functools.partial(
            _tiled_kernel_nolam if scalar_lam else _tiled_kernel_lam,
            scale=inv_total,
        )
        out = pl.pallas_call(
            kernel,
            out_shape=jax.ShapeDtypeStruct((1, 1), jnp.float32),
            grid_spec=pltpu.PrefetchScalarGridSpec(
                num_scalar_prefetch=0,
                grid=(padded_rows // _TILE_ROWS,),
                in_specs=[
                    pl.BlockSpec((_TILE_ROWS, LANES), lambda i: (i, 0))
                    for _ in streams
                ],
                out_specs=pl.BlockSpec((1, 1), lambda i: (0, 0)),
                scratch_shapes=[pltpu.VMEM((8, LANES), jnp.float32)],
            ),
            # Reduction axis with a shared accumulator must stay sequential.
            compiler_params=pltpu.CompilerParams(
                dimension_semantics=("arbitrary",)
            ),
        )(*streams)

    loss = out[0, 0]
    if scalar_lam:
        # mean(mse * 0.5**lam) == 0.5**lam * mean(mse) for scalar lam: fold the
        # decay outside the kernel and skip the third HBM stream entirely.
        loss = loss * jnp.exp2(-lam.reshape(()))
    return loss


if __name__ == "__main__":
    key = jax.random.PRNGKey(0)
    kx, ky, kl = jax.random.split(key, 3)

    # NCHW inputs, small shapes.
    x = jax.random.normal(kx, (2, 4, 16, 16), dtype=jnp.float32)
    y = jax.random.normal(ky, (2, 4, 16, 16), dtype=jnp.float32)
    lam = jax.random.uniform(kl, (2, 4, 16, 16), dtype=jnp.float32) * 3.0

    out = exp_decay_loss(x, y, lam)
    out = jax.block_until_ready(out)

    # Pure-JAX reference (mirrors the PyTorch forward exactly).
    ref = jnp.mean(jnp.square(x - y) * jnp.power(0.5, lam))
    assert jnp.allclose(out, ref, rtol=1e-5, atol=1e-6), (out, ref)

    print("KERNEL_OK")
</pallas_src>

<mosaic_0001>
module attributes {stable_mosaic.version = 11 : i64} {
  func.func @_single_kernel_lam(%arg0: memref<16x128xf32, #tpu.memory_space<vmem>>, %arg1: memref<16x128xf32, #tpu.memory_space<vmem>>, %arg2: memref<16x128xf32, #tpu.memory_space<vmem>>, %arg3: memref<1x1xf32, #tpu.memory_space<vmem>>) attributes {dimension_semantics = [], scalar_prefetch = 0 : i64, scratch_operands = 0 : i64, tpu.core_type = #tpu.core_type<tc>} {
    %c0 = arith.constant 0 : index
    %c0_0 = arith.constant 0 : index
    %0 = vector.load %arg0[%c0, %c0_0] : memref<16x128xf32, #tpu.memory_space<vmem>>, vector<16x128xf32>
    %c0_1 = arith.constant 0 : index
    %c0_2 = arith.constant 0 : index
    %1 = vector.load %arg1[%c0_1, %c0_2] : memref<16x128xf32, #tpu.memory_space<vmem>>, vector<16x128xf32>
    %2 = arith.subf %0, %1 : vector<16x128xf32>
    %3 = arith.mulf %2, %2 : vector<16x128xf32>
    %c0_3 = arith.constant 0 : index
    %c0_4 = arith.constant 0 : index
    %4 = vector.load %arg2[%c0_3, %c0_4] : memref<16x128xf32, #tpu.memory_space<vmem>>, vector<16x128xf32>
    %cst = arith.constant 0.000000e+00 : f32
    %5 = vector.broadcast %cst : f32 to vector<16x128xf32>
    %6 = arith.subf %5, %4 : vector<16x128xf32>
    %7 = math.exp2 %6 : vector<16x128xf32>
    %8 = arith.mulf %3, %7 : vector<16x128xf32>
    %9 = vector.shape_cast %8 : vector<16x128xf32> to vector<1x16x128xf32>
    %cst_5 = arith.constant dense<0.000000e+00> : vector<1xf32>
    %10 = vector.multi_reduction <add>, %9, %cst_5 [1, 2] : vector<1x16x128xf32> to vector<1xf32>
    %11 = vector.shape_cast %10 : vector<1xf32> to vector<1x1x1xf32>
    %12 = vector.extract %11[0, 0, 0] : f32 from vector<1x1x1xf32>
    %13 = vector.broadcast %12 : f32 to vector<1x1xf32>
    %cst_6 = arith.constant 4.8828125E-4 : f32
    %14 = vector.broadcast %cst_6 : f32 to vector<1x1xf32>
    %15 = arith.mulf %13, %14 : vector<1x1xf32>
    %c0_7 = arith.constant 0 : index
    %c0_8 = arith.constant 0 : index
    %16 = vector.load %arg3[%c0_7, %c0_8] : memref<1x1xf32, #tpu.memory_space<vmem>>, vector<1x1xf32>
    tpu.vector_store %arg3[%c0_7, %c0_8], %15 {strides = array<i32>} : memref<1x1xf32, #tpu.memory_space<vmem>>, vector<1x1xf32>,
    return
  }
}

</mosaic_0001>

<bundles_post_ra>
// kernel: tpu_custom_call.1
= control target key start
LH: loop header
LB: loop body
LE: loop exit
PB: predicated region body
PF: predicated region fallthrough
CT: control target
= control target key end

     0   :  { %8 = vsyncpa [#allocation3], 0  ;;  %s298_s0 = inlined_call_operand.hbm [shape: f32[16,128], index: 0, kind: input, shape index: {}]   ;;  %s299_s1 = inlined_call_operand.hbm [shape: f32[16,128], index: 1, kind: input, shape index: {}]   ;;  %s300_s2 = inlined_call_operand.hbm [shape: f32[16,128], index: 2, kind: input, shape index: {}]   ;;  %s301_s3 = inlined_call_operand.hbm [shape: f32[1,1], index: 3, kind: output, shape index: {}]  }
   0x1   :  { %9 = vsyncpa [#allocation6], 0 }
   0x2   :  { %10 = vsyncpa [#allocation4], 0  ;;  %s208_s12 = smov [#allocation5]   ;;  %s209_s14 = smov [#allocation2]  }
   0x3   :  { %s28_s13 = sshll.u32 %s208_s12, 4  ;;  %s16_s15 = sshll.u32 %s209_s14, 4  ;;  %s29_s13 = int_to_ptr.vmem [resolvable:$true] %s28_s13  ;;  %s234_s15 = int_to_ptr.vmem [resolvable:$true] %s16_s15 }
   0x4   :  { %s114_s18 = scalar_lea.hbm %s299_s1, 256 }
   0x5   :  { %p115_p0 = scmp.ne.s32.totalorder %s299_s1, %s114_s18  ;;  %p118_p1 = scmp.lt.u32.totalorder %s114_s18, %s299_s1 }
   0x7   :  { %p120_p2 = pnand %p118_p1, %p115_p0 }
   0x9   :  { %123 = shalt.err (!%p120_p2)
}
   0xa   :  { %s124_s23 = scalar_lea.vmem %s29_s13, 256  ;;  %p129_p4 = scmp.lt.s32.totalorder %s29_s13, %s29_s13 }
   0xb   :  { %p125_p3 = scmp.ne.s32.totalorder %s29_s13, %s124_s23  ;;  %p130_p5 = scmp.lt.s32.totalorder %s124_s23, %s124_s23 }
   0xd   :  { %p131_p6 = por %p130_p5, %p129_p4 }
   0xf   :  { %p132_p7 = pnand %p131_p6, %p125_p3 }
  0x11   :  { %135 = shalt.err (!%p132_p7)
}
  0x12   :  { %s210_s24 = smov 128   ;;  %s211_s25 = smov 8  }
  0x13   :  { %34 = dma.hbm_to_vmem [thread:$0]  %s299_s1, 256, %s29_s13, [#allocation6], %s210_s24, %s210_s24, %s211_s25  }
  0x14   :  { %s136_s30 = scalar_lea.hbm %s298_s0, 256 }
  0x15   :  { %p137_p8 = scmp.ne.s32.totalorder %s298_s0, %s136_s30  ;;  %p140_p9 = scmp.lt.u32.totalorder %s136_s30, %s298_s0 }
  0x17   :  { %p142_p10 = pnand %p140_p9, %p137_p8 }
  0x19   :  { %145 = shalt.err (!%p142_p10)
}
  0x1a   :  { %s146_s8 = scalar_lea.vmem %s234_s15, 256  ;;  %p151_p12 = scmp.lt.s32.totalorder %s234_s15, %s234_s15 }
  0x1b   :  { %p147_p11 = scmp.ne.s32.totalorder %s234_s15, %s146_s8  ;;  %p152_p13 = scmp.lt.s32.totalorder %s146_s8, %s146_s8 }
  0x1d   :  { %p153_p0 = por %p152_p13, %p151_p12 }
  0x1f   :  { %p154_p1 = pnand %p153_p0, %p147_p11 }
  0x21   :  { %157 = shalt.err (!%p154_p1)
}
  0x22   :  { %22 = dma.hbm_to_vmem [thread:$0]  %s298_s0, 256, %s234_s15, [#allocation3], %s210_s24, %s210_s24, %s211_s25  }
  0x23   :  { %s212_s10 = smov [#allocation7]   ;;  %s158_s14 = scalar_lea.hbm %s300_s2, 256 }
  0x24   :  { %s40_s11 = sshll.u32 %s212_s10, 4  ;;  %p159_p2 = scmp.ne.s32.totalorder %s300_s2, %s158_s14  ;;  %s41_s11 = int_to_ptr.vmem [resolvable:$true] %s40_s11 }
  0x25   :  { %p162_p3 = scmp.lt.u32.totalorder %s158_s14, %s300_s2 }
  0x27   :  { %p164_p4 = pnand %p162_p3, %p159_p2 }
  0x29   :  { %167 = shalt.err (!%p164_p4)
}
  0x2a   :  { %s168_s20 = scalar_lea.vmem %s41_s11, 256  ;;  %p173_p6 = scmp.lt.s32.totalorder %s41_s11, %s41_s11 }
  0x2b   :  { %p169_p5 = scmp.ne.s32.totalorder %s41_s11, %s168_s20  ;;  %p174_p7 = scmp.lt.s32.totalorder %s168_s20, %s168_s20 }
  0x2d   :  { %p175_p8 = por %p174_p7, %p173_p6 }
  0x2f   :  { %p176_p9 = pnand %p175_p8, %p169_p5 }
  0x31   :  { %179 = shalt.err (!%p176_p9)
}
  0x32   :  { %46 = dma.hbm_to_vmem [thread:$0]  %s300_s2, 256, %s41_s11, [#allocation6], %s210_s24, %s210_s24, %s211_s25  }
  0x33   :  { %202 = dma.done.wait [#allocation3], 256  }
  0x34   :  { %203 = vsyncadd [#allocation3], 4294967040 }
  0x35   :  { %204 = dma.done.wait [#allocation6], 512  }
  0x36   :  { %205 = vsyncadd [#allocation6], 4294966784  ;;  %v64_v0 = vld [vmem:[#allocation7] sm:$0xff]  ;;  %v65_v1 = vld [vmem:[#allocation7 + $0x8] sm:$0xff]  ;;  %s213_s2 = smov [#allocation8]   ;;  %vm84_vm0 = vcmask 0  }
  0x37   :  { %v66_v2 = vsub.f32 0.0, %v64_v0  ;;  %v67_v3 = vsub.f32 0.0, %v65_v1  ;;  %v56_v4 = vld [vmem:[#allocation2] sm:$0xff]  ;;  %v58_v5 = vld [vmem:[#allocation5] sm:$0xff]  ;;  %v57_v6 = vld [vmem:[#allocation2 + $0x8] sm:$0xff]  ;;  %s92_s21 = sshll.u32 %s213_s2, 4  ;;  %s93_s21 = int_to_ptr.vmem [resolvable:$true] %s92_s21 }
  0x38   :  { %v59_v7 = vld [vmem:[#allocation5 + $0x8] sm:$0xff]  ;;  %v60_v8 = vsub.f32 %v56_v4, %v58_v5  ;;  %s180_s23 = scalar_lea.vmem %s93_s21, 16  ;;  %s184_s24 = scalar_lea.vmem %s93_s21, 32 }
  0x39   :  { %110 = vpow2.f32 %v66_v2  ;;  %v61_v9 = vsub.f32 %v57_v6, %v59_v7  ;;  %p181_p10 = scmp.ne.s32.totalorder %s93_s21, %s180_s23  ;;  %p185_p11 = scmp.lt.s32.totalorder %s93_s21, %s93_s21 }
  0x3a   :  { %112 = vpow2.f32 %v67_v3  ;;  %v62_v10 = vmul.f32 %v60_v8, %v60_v8  ;;  %p186_p12 = scmp.lt.s32.totalorder %s184_s24, %s180_s23 }
  0x3b   :  { %v63_v11 = vmul.f32 %v61_v9, %v61_v9 }
  0x3c   :  { %p187_p13 = por %p186_p12, %p185_p11 }
  0x3e   :  { %p188_p0 = pnand %p187_p13, %p181_p10 }
  0x43   :  { %v111_v12 = vpop.eup %110 }
  0x44   :  { %v113_v13 = vpop.eup %112  ;;  %v70_v14 = vmul.f32 %v111_v12, %v62_v10 }
  0x45   :  { %v71_v15 = vmul.f32 %v113_v13, %v63_v11 }
  0x47   :  { %v72_v16 = vadd.f32 %v71_v15, %v70_v14 }
  0x49   :  { %73 = vadd.xlane.f32.xlu0 %v72_v16 }
  0xd6   :  { %v74_v17 = vpop.xlane.xlu0 %73 }
  0xd7   :  { %v75_v18 = vrot.slane %v74_v17, 4 }
  0xd9   :  { %v76_v19 = vadd.f32 %v75_v18, %v74_v17 }
  0xdb   :  { %v77_v20 = vrot.slane %v76_v19, 2 }
  0xdd   :  { %v78_v21 = vadd.f32 %v77_v20, %v76_v19 }
  0xdf   :  { %v79_v22 = vrot.slane %v78_v21, 1 }
  0xe1   :  { %v80_v23 = vadd.f32 %v79_v22, %v78_v21 }
  0xe3   :  { %102 = vpush %v80_v23 }
 0x114   :  { %s103_s22 = spop %102 }
 0x115   :  { %v82_v24 = vstv %s103_s22 }
 0x116   :  { %v83_v25 = vmul.f32 0.00048828125, %v82_v24 }
 0x118   :  { %85 = vst.msk [vmem:[#allocation8] sm:$0x1] %vm84_vm0, %v83_v25 }
 0x119   :  { %191 = shalt.err (!%p188_p0)
}
 0x11a   :  { %s192_s27 = scalar_lea.hbm %s301_s3, 16 }
 0x11b   :  { %p193_p1 = scmp.ne.s32.totalorder %s301_s3, %s192_s27  ;;  %p196_p2 = scmp.lt.u32.totalorder %s192_s27, %s301_s3 }
 0x11d   :  { %p198_p3 = pnand %p196_p2, %p193_p1 }
 0x11f   :  { %201 = shalt.err (!%p198_p3)
}
 0x120   :  { %95 = dma.vmem_to_hbm [thread:$0]  %s93_s21, 16, %s301_s3, [#allocation4]  }
 0x121   :  { %206 = dma.done.wait [#allocation4], 16  }
 0x122   :  { %207 = vsyncadd [#allocation4], 4294967280 }
 0x123   :  { %99 = vsyncpa [#allocation3], 1 }
 0x124   :  { %100 = vsyncpa [#allocation6], 1 }
 0x125   :  { %101 = vsyncpa [#allocation4], 1 }

</bundles_post_ra>
